<compile_context>
chip_gen: v6e
topology: v6e:2x2x1
jax: 0.10.0
libtpu: 0.0.40
codegen_flags: <defaults>
</compile_context>

<pallas_src>
import jax
import jax.numpy as jnp
from jax.experimental import pallas as pl
from jax.experimental.pallas import tpu as pltpu

_TARGET_TILE_BYTES = 2 * 1024 * 1024   # ~2 MiB f32 per tile
_MAX_TILE_D = 2048                     # lane-dense last dim (large multiple of 128)
_MERGE_TARGET_LANES = 1024             # fold narrow feature dims up to ~1024 lanes


def _mean_act_kernel(x_ref, o_ref):
    # Elementwise hot path: exp on the EUP, clamp (two compares/selects) on the VPU.
    x = x_ref[...].astype(jnp.float32)
    y = jnp.clip(jnp.exp(x), 1e-05, 1e06)
    o_ref[...] = y.astype(o_ref.dtype)


def mean_act(x):
    """clamp(exp(x), 1e-5, 1e6) for any-rank input (scDCC MeanAct forward)."""
    orig_shape = x.shape
    out_dtype = x.dtype
    if x.size == 0:
        return x

    # ---- layout plumbing: only free row-major reshapes, no pad / slice copies ----
    if x.ndim == 0:
        x2 = x.reshape(1, 1)
    elif x.ndim == 1:
        x2 = x.reshape(1, -1)
    else:
        x2 = x.reshape(-1, orig_shape[-1])
    N, D = x2.shape

    # Narrow feature dims waste lanes; fold pairs of rows into the lane axis while
    # it remains a free (contiguous, row-major) reshape.
    merge = 1
    while D * merge < _MERGE_TARGET_LANES and N % (2 * merge) == 0:
        merge *= 2
    if merge > 1:
        x2 = x2.reshape(N // merge, D * merge)
        N, D = x2.shape

    # ---- tile selection (no padding: ragged edge blocks are handled by Pallas) ----
    # Block dims are either multiples of (8, 128) or equal the full array dims.
    tile_d = D if D <= _MAX_TILE_D else _MAX_TILE_D
    if N < 8:
        tile_n = N                                           # full sublane dim
    else:
        budget_rows = max(8, _TARGET_TILE_BYTES // (4 * tile_d))
        tile_n = max(8, min((budget_rows // 8) * 8, (N // 8) * 8))
    grid = (pl.cdiv(N, tile_n), pl.cdiv(D, tile_d))

    n_elems = x2.size
    cost = pl.CostEstimate(
        flops=2 * n_elems,                               # the two clamp compares
        transcendentals=n_elems,                         # one exp per element
        bytes_accessed=2 * n_elems * x2.dtype.itemsize,  # read + write, once each
    )

    out = pl.pallas_call(
        _mean_act_kernel,
        out_shape=jax.ShapeDtypeStruct((N, D), out_dtype),
        grid_spec=pltpu.PrefetchScalarGridSpec(
            num_scalar_prefetch=0,
            grid=grid,
            in_specs=[pl.BlockSpec((tile_n, tile_d), lambda i, j: (i, j))],
            out_specs=pl.BlockSpec((tile_n, tile_d), lambda i, j: (i, j)),
        ),
        compiler_params=pltpu.CompilerParams(
            dimension_semantics=("parallel", "parallel"),
        ),
        cost_estimate=cost,
    )(x2)

    return out.reshape(orig_shape)


if __name__ == "__main__":
    key = jax.random.PRNGKey(0)
    k0, k1, k2 = jax.random.split(key, 3)

    # Primary small shape consistent with MeanAct usage (decoder output: batch x genes).
    x = jax.random.normal(k0, (8, 32), dtype=jnp.float32) * 3.0
    y = mean_act(x)
    jax.block_until_ready(y)
    y_ref = jnp.clip(jnp.exp(x), 1e-05, 1e06)
    assert y.shape == x.shape and y.dtype == x.dtype
    assert jnp.allclose(y, y_ref, rtol=1e-6, atol=1e-6)

    # Unaligned shape: exercises full-dim (non-(8,128)-multiple) blocks, no padding path.
    xb = jax.random.normal(k1, (3, 1000), dtype=jnp.float32) * 3.0
    yb = mean_act(xb)
    jax.block_until_ready(yb)
    assert jnp.allclose(yb, jnp.clip(jnp.exp(xb), 1e-05, 1e06), rtol=1e-6, atol=1e-6)

    # Wider shape: exercises a multi-block grid and the row-merge path.
    xc = jax.random.normal(k2, (64, 4096), dtype=jnp.float32) * 3.0
    yc = mean_act(xc)
    jax.block_until_ready(yc)
    assert jnp.allclose(yc, jnp.clip(jnp.exp(xc), 1e-05, 1e06), rtol=1e-6, atol=1e-6)

    print("KERNEL_OK")
</pallas_src>

<mosaic_0001>
module attributes {stable_mosaic.version = 11 : i64} {
  func.func @_mean_act_kernel(%arg0: i32, %arg1: i32, %arg2: memref<1x256xf32, #tpu.memory_space<vmem>>, %arg3: memref<1x256xf32, #tpu.memory_space<vmem>>) attributes {dimension_semantics = [#tpu.dimension_semantics<parallel>, #tpu.dimension_semantics<parallel>], iteration_bounds = array<i64: 1, 1>, scalar_prefetch = 0 : i64, scratch_operands = 0 : i64, tpu.core_type = #tpu.core_type<tc>, window_params = [{transform_indices = @transform_0, window_bounds = array<i64: 1, 256>}, {transform_indices = @transform_1, window_bounds = array<i64: 1, 256>}]} {
    %c0 = arith.constant 0 : index
    %c0_0 = arith.constant 0 : index
    %0 = vector.load %arg2[%c0, %c0_0] : memref<1x256xf32, #tpu.memory_space<vmem>>, vector<1x256xf32>
    %1 = math.exp %0 : vector<1x256xf32>
    %cst = arith.constant 9.99999974E-6 : f32
    %cst_1 = arith.constant 1.000000e+06 : f32
    %2 = vector.broadcast %cst : f32 to vector<1x256xf32>
    %3 = arith.maximumf %2, %1 : vector<1x256xf32>
    %4 = vector.broadcast %cst_1 : f32 to vector<1x256xf32>
    %5 = arith.minimumf %4, %3 : vector<1x256xf32>
    %c0_2 = arith.constant 0 : index
    %c0_3 = arith.constant 0 : index
    %6 = vector.load %arg3[%c0_2, %c0_3] : memref<1x256xf32, #tpu.memory_space<vmem>>, vector<1x256xf32>
    tpu.vector_store %arg3[%c0_2, %c0_3], %5 {strides = array<i32>} : memref<1x256xf32, #tpu.memory_space<vmem>>, vector<1x256xf32>,
    return
  }
  func.func @transform_0(%arg0: i32, %arg1: i32) -> (i32, i32) {
    %c0_i32 = arith.constant 0 : i32
    return %arg0, %arg1 : i32, i32
  }
  func.func @transform_1(%arg0: i32, %arg1: i32) -> (i32, i32) {
    %c0_i32 = arith.constant 0 : i32
    return %arg0, %arg1 : i32, i32
  }
}

</mosaic_0001>

<bundles_post_ra>
// kernel: tpu_custom_call.1
= control target key start
LH: loop header
LB: loop body
LE: loop exit
PB: predicated region body
PF: predicated region fallthrough
CT: control target
= control target key end

     0   :  { %6 = vsyncpa [#allocation3], 0  ;;  %s112_s0 = inlined_call_operand.hbm [shape: f32[1,256], index: 0, kind: input, shape index: {}]   ;;  %s113_s1 = inlined_call_operand.hbm [shape: f32[1,256], index: 1, kind: output, shape index: {}]  }
   0x1   :  { %7 = vsyncpa [#allocation4], 0  ;;  %s94_s6 = smov [#allocation2]  }
   0x2   :  { %s14_s7 = sshll.u32 %s94_s6, 4  ;;  %s15_s7 = int_to_ptr.vmem [resolvable:$true] %s14_s7 }
   0x3   :  { %s58_s8 = scalar_lea.vmem %s15_s7, 32  ;;  %p63_p1 = scmp.lt.s32.totalorder %s15_s7, %s15_s7 }
   0x4   :  { %p59_p0 = scmp.ne.s32.totalorder %s15_s7, %s58_s8  ;;  %p64_p2 = scmp.lt.s32.totalorder %s58_s8, %s58_s8 }
   0x6   :  { %p65_p3 = por %p64_p2, %p63_p1 }
   0x8   :  { %p66_p4 = pnand %p65_p3, %p59_p0 }
   0xa   :  { %69 = shalt.err (!%p66_p4)
}
   0xb   :  { %17 = dma.hbm_to_vmem [thread:$0]  %s112_s0, 32, %s15_s7, [#allocation3]  }
   0xc   :  { %90 = dma.done.wait [#allocation3], 32  }
   0xd   :  { %91 = vsyncadd [#allocation3], 4294967264  ;;  %v21_v0 = vld [vmem:[#allocation2] sm:$0x3]  ;;  %v26_v2 = vlaneseq  ;;  %s95_s11 = smov [#allocation5]  }
   0xe   :  { %v22_v1 = vmul.f32 1.442695, %v21_v0  ;;  %s37_s12 = sshll.u32 %s95_s11, 4  ;;  %s38_s12 = int_to_ptr.vmem [resolvable:$true] %s37_s12 }
   0xf   :  { %vm28_vm0 = vcmp.lt.s32.totalorder %v26_v2, 256  ;;  %s70_s13 = scalar_lea.vmem %s38_s12, 32  ;;  %p75_p6 = scmp.lt.s32.totalorder %s38_s12, %s38_s12 }
  0x10   :  { %48 = vpow2.f32 %v22_v1  ;;  %p71_p5 = scmp.ne.s32.totalorder %s38_s12, %s70_s13  ;;  %p76_p7 = scmp.lt.s32.totalorder %s70_s13, %s70_s13 }
  0x12   :  { %p77_p8 = por %p76_p7, %p75_p6 }
  0x14   :  { %p78_p9 = pnand %p77_p8, %p71_p5 }
  0x1d   :  { %v49_v3 = vpop.eup %48 }
  0x1e   :  { %v24_v4 = vmax.f32 %v49_v3, 1e-05 }
  0x20   :  { %v25_v5 = vmin.f32 %v24_v4, 1000000.0 }
  0x22   :  { %30 = vst.msk [vmem:[#allocation5] sm:$0x3] %vm28_vm0, %v25_v5 }
  0x23   :  { %81 = shalt.err (!%p78_p9)
}
  0x24   :  { %40 = dma.vmem_to_hbm [thread:$0]  %s38_s12, 32, %s113_s1, [#allocation4]  }
  0x25   :  { %92 = dma.done.wait [#allocation4], 32  }
  0x26   :  { %93 = vsyncadd [#allocation4], 4294967264 }
  0x27   :  { %44 = vsyncpa [#allocation3], 1 }
  0x28   :  { %45 = vsyncpa [#allocation4], 1 }

</bundles_post_ra>
